<compile_context>
chip_gen: v7x
topology: tpu7x:2x2x1
jax: 0.10.0
libtpu: 0.0.40
codegen_flags: <defaults>
</compile_context>

<pallas_src>
import jax
import jax.numpy as jnp
from jax.experimental import pallas as pl
from jax.experimental.pallas import tpu as pltpu

_LANE = 128          # lane width: pad the hidden dim to a multiple of this
_BF16_SUBLANE = 16   # a bf16 vreg packs [16, 128]; keep batch tiles x16

_HAS_BUFFERED = hasattr(pl, "Buffered")


def _round_up(x, m):
    return ((x + m - 1) // m) * m


def _pad2(a, rows, cols):
    r, c = a.shape
    if r == rows and c == cols:
        return a
    return jnp.pad(a, ((0, rows - r), (0, cols - c)))


def _vmem_capacity_bytes():
    """Per-core VMEM capacity; conservative fallback = smallest part (v7x, 64 MiB)."""
    try:
        cap = getattr(pltpu.get_tpu_info(), "vmem_capacity_bytes", None)
        if cap:
            return int(cap)
    except Exception:  # capability probe only; kernel errors are never caught here
        pass
    return 64 << 20


def _mlp_kernel(x_ref, w1_ref, b1_ref, w2_ref, b2_ref, w3_ref, b3_ref, o_ref):
    # x arrives as f32 straight from HBM; per-tile bf16 cast (cheap VPU work).
    x = x_ref[...].astype(jnp.bfloat16)
    # Layer 1: bf16 MXU matmul with f32 accumulation; bias + ReLU in f32.
    h = jnp.dot(x, w1_ref[...], preferred_element_type=jnp.float32)
    h = jnp.maximum(h + b1_ref[...], 0.0)
    # Layer 2
    h = jnp.dot(h.astype(jnp.bfloat16), w2_ref[...],
                preferred_element_type=jnp.float32)
    h = jnp.maximum(h + b2_ref[...], 0.0)
    # Layer 3 (logits, no activation)
    out = jnp.dot(h.astype(jnp.bfloat16), w3_ref[...],
                  preferred_element_type=jnp.float32)
    o_ref[...] = (out + b3_ref[...]).astype(o_ref.dtype)


def _const_spec(shape):
    """Grid-invariant operand (weights / biases): same block every grid step.

    Single-buffer it (halves its VMEM residency) when pipeline_mode=Buffered
    is available in this JAX version; otherwise use the default spec.  This is
    a narrow feature check -- no broad try/except around the kernel call.
    """
    if _HAS_BUFFERED:
        return pl.BlockSpec(shape, lambda i: (0, 0),
                            pipeline_mode=pl.Buffered(1))
    return pl.BlockSpec(shape, lambda i: (0, 0))


def prepare_params(params):
    """One-time pad + bf16 cast of the weights (call once, reuse across calls).

    Only the hidden dim is padded to a lane multiple; the input/output feature
    dims are left untouched so x and the kernel output need no wrapper copies.
    """
    in_f, hid = params["w1"].shape
    out_f = params["w3"].shape[1]
    hid_p = _round_up(hid, _LANE)
    # TODO(synk): on v6e/v7x (256-wide MXU) measure padding hid to a multiple
    # of 256 for hidden sizes that are odd multiples of 128.
    return {
        "w1": _pad2(params["w1"], in_f, hid_p).astype(jnp.bfloat16),
        "b1": _pad2(params["b1"], 1, hid_p).astype(jnp.float32),
        "w2": _pad2(params["w2"], hid_p, hid_p).astype(jnp.bfloat16),
        "b2": _pad2(params["b2"], 1, hid_p).astype(jnp.float32),
        "w3": _pad2(params["w3"], hid_p, out_f).astype(jnp.bfloat16),
        "b3": params["b3"].astype(jnp.float32),
        "dims": (in_f, hid, out_f, hid_p),
    }


def chat_model_v2_forward(x, prepared, *, batch_tile=None):
    """Fused 3-layer MLP forward.

    x:        (B, input_feature) float32 -- passed to the kernel as-is.
    prepared: output of prepare_params() (padded bf16 weights, f32 biases).
    Returns (B, out_feature) float32 logits.
    """
    B, in_f = x.shape
    in_f_p, hid, out_f, hid_p = prepared["dims"]
    assert in_f == in_f_p, "x feature dim does not match prepared params"

    vmem_cap = _vmem_capacity_bytes()

    # Batch tile: multiple of 16 (bf16 vreg packing); aim for >= 2 grid steps
    # so both v7x TensorCores get work; larger default tile on 128 MiB parts.
    if batch_tile is None:
        batch_tile = 512 if vmem_cap >= (96 << 20) else 256
    tb = _round_up(max(16, min(batch_tile, pl.cdiv(B, 2))), _BF16_SUBLANE)
    tb = min(tb, _round_up(B, _BF16_SUBLANE))
    n_steps = pl.cdiv(B, tb)  # final partial batch block is masked by Pallas

    w_bytes = (prepared["w1"].size + prepared["w2"].size
               + prepared["w3"].size) * 2
    b_bytes = (prepared["b1"].size + prepared["b2"].size
               + prepared["b3"].size) * 4
    n_wbuf = 1 if _HAS_BUFFERED else 2

    est = (tb * in_f * 4 * 2               # x tile, f32, double-buffered
           + tb * out_f * 4 * 2            # out tile, f32, double-buffered
           + (w_bytes + b_bytes) * n_wbuf  # resident weights / biases
           + tb * hid_p * (4 + 2) * 2)     # in-kernel h (f32) + bf16 copy
    # Leave ~20% of physical VMEM for compiler-internal scratch.
    vmem_limit = int(min(0.8 * vmem_cap, max(32 << 20, 2 * est)))

    cost = pl.CostEstimate(
        flops=2 * B * (in_f * hid_p + hid_p * hid_p + hid_p * out_f),
        transcendentals=0,
        bytes_accessed=x.size * 4 + w_bytes + b_bytes + B * out_f * 4,
    )

    grid_spec = pltpu.PrefetchScalarGridSpec(
        num_scalar_prefetch=0,
        grid=(n_steps,),
        in_specs=[
            pl.BlockSpec((tb, in_f), lambda i: (i, 0)),   # x: batch-tiled, f32
            _const_spec((in_f, hid_p)),                   # w1
            _const_spec((1, hid_p)),                      # b1
            _const_spec((hid_p, hid_p)),                  # w2
            _const_spec((1, hid_p)),                      # b2
            _const_spec((hid_p, out_f)),                  # w3
            _const_spec((1, out_f)),                      # b3
        ],
        out_specs=pl.BlockSpec((tb, out_f), lambda i: (i, 0)),
    )

    out = pl.pallas_call(
        _mlp_kernel,
        out_shape=jax.ShapeDtypeStruct((B, out_f), jnp.float32),
        grid_spec=grid_spec,
        compiler_params=pltpu.CompilerParams(
            dimension_semantics=("parallel",),
            vmem_limit_bytes=vmem_limit,
        ),
        cost_estimate=cost,
    )(x, prepared["w1"], prepared["b1"], prepared["w2"], prepared["b2"],
      prepared["w3"], prepared["b3"])

    # TODO(synk): for hidden sizes where the (hid_p, hid_p) bf16 w2 cannot stay
    # VMEM-resident (~5-6k on v7x, ~8k on 128 MiB parts), add a K-tiled
    # "arbitrary" reduction grid axis for layer 2 with a pl.when-initialized
    # f32 VMEM accumulator instead of shrinking the batch tile.
    return out


def init_params(key, input_feature, hidden_feature, out_feature):
    """Deterministic init mimicking nn.Linear (uniform(-1/sqrt(fan_in), +))."""
    ks = jax.random.split(key, 6)

    def linear(kw, kb, fan_in, fan_out):
        bound = 1.0 / jnp.sqrt(fan_in)
        # stored transposed: (in, out)
        w = jax.random.uniform(kw, (fan_in, fan_out), jnp.float32, -bound, bound)
        b = jax.random.uniform(kb, (1, fan_out), jnp.float32, -bound, bound)
        return w, b

    w1, b1 = linear(ks[0], ks[1], input_feature, hidden_feature)
    w2, b2 = linear(ks[2], ks[3], hidden_feature, hidden_feature)
    w3, b3 = linear(ks[4], ks[5], hidden_feature, out_feature)
    return {"w1": w1, "b1": b1, "w2": w2, "b2": b2, "w3": w3, "b3": b3}


def reference_forward(x, p):
    """Pure-JAX reference mirroring the kernel math (bf16 weights, f32 accum)."""
    xb = x.astype(jnp.bfloat16)
    w1 = p["w1"].astype(jnp.bfloat16)
    w2 = p["w2"].astype(jnp.bfloat16)
    w3 = p["w3"].astype(jnp.bfloat16)
    h = jnp.dot(xb, w1, preferred_element_type=jnp.float32) + p["b1"]
    h = jnp.maximum(h, 0.0)
    h = jnp.dot(h.astype(jnp.bfloat16), w2,
                preferred_element_type=jnp.float32) + p["b2"]
    h = jnp.maximum(h, 0.0)
    return jnp.dot(h.astype(jnp.bfloat16), w3,
                   preferred_element_type=jnp.float32) + p["b3"]


if __name__ == "__main__":
    key = jax.random.PRNGKey(0)
    k_x, k_p = jax.random.split(key)

    B, IN_F, HID, OUT_F = 8, 16, 32, 8
    x = jax.random.normal(k_x, (B, IN_F), jnp.float32)
    params = init_params(k_p, IN_F, HID, OUT_F)

    # Pad + cast the weights once; reuse the prepared params across calls.
    prepared = prepare_params(params)

    y = chat_model_v2_forward(x, prepared)
    y = jax.block_until_ready(y)
    assert y.shape == (B, OUT_F)

    # Correctness: compare against a pure-JAX reference of the same math.
    y_ref = reference_forward(x, params)
    assert jnp.allclose(y, y_ref, atol=2e-3, rtol=2e-3), float(
        jnp.max(jnp.abs(y - y_ref)))

    # predict() equivalent: argmax of softmax over dim=1 (plain-JAX glue).
    preds = jnp.argmax(jax.nn.softmax(y, axis=1), axis=1)
    _ = jax.block_until_ready(preds)

    print("KERNEL_OK")
</pallas_src>

<mosaic_0001>
module attributes {stable_mosaic.version = 11 : i64} {
  func.func @_mlp_kernel(%arg0: i32, %arg1: memref<16x16xf32, #tpu.memory_space<vmem>>, %arg2: memref<16x128xbf16, #tpu.memory_space<vmem>>, %arg3: memref<1x128xf32, #tpu.memory_space<vmem>>, %arg4: memref<128x128xbf16, #tpu.memory_space<vmem>>, %arg5: memref<1x128xf32, #tpu.memory_space<vmem>>, %arg6: memref<128x8xbf16, #tpu.memory_space<vmem>>, %arg7: memref<1x8xf32, #tpu.memory_space<vmem>>, %arg8: memref<16x8xf32, #tpu.memory_space<vmem>>) attributes {dimension_semantics = [#tpu.dimension_semantics<parallel>], iteration_bounds = array<i64: 1>, scalar_prefetch = 0 : i64, scratch_operands = 0 : i64, tpu.core_type = #tpu.core_type<tc>, window_params = [{transform_indices = @transform_0, window_bounds = array<i64: 16, 16>}, {pipeline_mode = #tpu.pipeline_mode<synchronous>, transform_indices = @transform_1, window_bounds = array<i64: 16, 128>}, {pipeline_mode = #tpu.pipeline_mode<synchronous>, transform_indices = @transform_2, window_bounds = array<i64: 1, 128>}, {pipeline_mode = #tpu.pipeline_mode<synchronous>, transform_indices = @transform_3, window_bounds = array<i64: 128, 128>}, {pipeline_mode = #tpu.pipeline_mode<synchronous>, transform_indices = @transform_4, window_bounds = array<i64: 1, 128>}, {pipeline_mode = #tpu.pipeline_mode<synchronous>, transform_indices = @transform_5, window_bounds = array<i64: 128, 8>}, {pipeline_mode = #tpu.pipeline_mode<synchronous>, transform_indices = @transform_6, window_bounds = array<i64: 1, 8>}, {transform_indices = @transform_7, window_bounds = array<i64: 16, 8>}]} {
    %c0 = arith.constant 0 : index
    %c0_0 = arith.constant 0 : index
    %0 = vector.load %arg1[%c0, %c0_0] : memref<16x16xf32, #tpu.memory_space<vmem>>, vector<16x16xf32>
    %1 = arith.truncf %0 : vector<16x16xf32> to vector<16x16xbf16>
    %c0_1 = arith.constant 0 : index
    %c0_2 = arith.constant 0 : index
    %2 = vector.load %arg2[%c0_1, %c0_2] : memref<16x128xbf16, #tpu.memory_space<vmem>>, vector<16x128xbf16>
    %cst = arith.constant dense<0.000000e+00> : vector<16x128xf32>
    %3 = tpu.matmul %1, %2, %cst {dimension_numbers = #tpu.dot_dimension_numbers<[1], [0], [0], [1], [0, 0, 1, 1], [], []>} : vector<16x16xbf16>, vector<16x128xbf16>, vector<16x128xf32> -> vector<16x128xf32>
    %c0_3 = arith.constant 0 : index
    %c0_4 = arith.constant 0 : index
    %4 = vector.load %arg3[%c0_3, %c0_4] : memref<1x128xf32, #tpu.memory_space<vmem>>, vector<1x128xf32>
    %5 = vector.broadcast %4 : vector<1x128xf32> to vector<16x128xf32>
    %6 = arith.addf %3, %5 : vector<16x128xf32>
    %cst_5 = arith.constant 0.000000e+00 : f32
    %7 = vector.broadcast %cst_5 : f32 to vector<16x128xf32>
    %8 = arith.maximumf %6, %7 : vector<16x128xf32>
    %9 = arith.truncf %8 : vector<16x128xf32> to vector<16x128xbf16>
    %c0_6 = arith.constant 0 : index
    %c0_7 = arith.constant 0 : index
    %10 = vector.load %arg4[%c0_6, %c0_7] : memref<128x128xbf16, #tpu.memory_space<vmem>>, vector<128x128xbf16>
    %cst_8 = arith.constant dense<0.000000e+00> : vector<16x128xf32>
    %11 = tpu.matmul %9, %10, %cst_8 {dimension_numbers = #tpu.dot_dimension_numbers<[1], [0], [0], [1], [0, 0, 1, 1], [], []>} : vector<16x128xbf16>, vector<128x128xbf16>, vector<16x128xf32> -> vector<16x128xf32>
    %c0_9 = arith.constant 0 : index
    %c0_10 = arith.constant 0 : index
    %12 = vector.load %arg5[%c0_9, %c0_10] : memref<1x128xf32, #tpu.memory_space<vmem>>, vector<1x128xf32>
    %13 = vector.broadcast %12 : vector<1x128xf32> to vector<16x128xf32>
    %14 = arith.addf %11, %13 : vector<16x128xf32>
    %cst_11 = arith.constant 0.000000e+00 : f32
    %15 = vector.broadcast %cst_11 : f32 to vector<16x128xf32>
    %16 = arith.maximumf %14, %15 : vector<16x128xf32>
    %17 = arith.truncf %16 : vector<16x128xf32> to vector<16x128xbf16>
    %c0_12 = arith.constant 0 : index
    %c0_13 = arith.constant 0 : index
    %18 = vector.load %arg6[%c0_12, %c0_13] : memref<128x8xbf16, #tpu.memory_space<vmem>>, vector<128x8xbf16>
    %cst_14 = arith.constant dense<0.000000e+00> : vector<16x8xf32>
    %19 = tpu.matmul %17, %18, %cst_14 {dimension_numbers = #tpu.dot_dimension_numbers<[1], [0], [0], [1], [0, 0, 1, 1], [], []>} : vector<16x128xbf16>, vector<128x8xbf16>, vector<16x8xf32> -> vector<16x8xf32>
    %c0_15 = arith.constant 0 : index
    %c0_16 = arith.constant 0 : index
    %20 = vector.load %arg7[%c0_15, %c0_16] : memref<1x8xf32, #tpu.memory_space<vmem>>, vector<1x8xf32>
    %21 = vector.broadcast %20 : vector<1x8xf32> to vector<16x8xf32>
    %22 = arith.addf %19, %21 : vector<16x8xf32>
    %c0_17 = arith.constant 0 : index
    %c0_18 = arith.constant 0 : index
    %23 = vector.load %arg8[%c0_17, %c0_18] : memref<16x8xf32, #tpu.memory_space<vmem>>, vector<16x8xf32>
    tpu.vector_store %arg8[%c0_17, %c0_18], %22 {strides = array<i32>} : memref<16x8xf32, #tpu.memory_space<vmem>>, vector<16x8xf32>,
    return
  }
  func.func @transform_0(%arg0: i32) -> (i32, i32) {
    %c0_i32 = arith.constant 0 : i32
    %c0_i32_0 = arith.constant 0 : i32
    return %arg0, %c0_i32 : i32, i32
  }
  func.func @transform_1(%arg0: i32) -> (i32, i32) {
    %c0_i32 = arith.constant 0 : i32
    %c0_i32_0 = arith.constant 0 : i32
    %c0_i32_1 = arith.constant 0 : i32
    return %c0_i32, %c0_i32_0 : i32, i32
  }
  func.func @transform_2(%arg0: i32) -> (i32, i32) {
    %c0_i32 = arith.constant 0 : i32
    %c0_i32_0 = arith.constant 0 : i32
    %c0_i32_1 = arith.constant 0 : i32
    return %c0_i32, %c0_i32_0 : i32, i32
  }
  func.func @transform_3(%arg0: i32) -> (i32, i32) {
    %c0_i32 = arith.constant 0 : i32
    %c0_i32_0 = arith.constant 0 : i32
    %c0_i32_1 = arith.constant 0 : i32
    return %c0_i32, %c0_i32_0 : i32, i32
  }
  func.func @transform_4(%arg0: i32) -> (i32, i32) {
    %c0_i32 = arith.constant 0 : i32
    %c0_i32_0 = arith.constant 0 : i32
    %c0_i32_1 = arith.constant 0 : i32
    return %c0_i32, %c0_i32_0 : i32, i32
  }
  func.func @transform_5(%arg0: i32) -> (i32, i32) {
    %c0_i32 = arith.constant 0 : i32
    %c0_i32_0 = arith.constant 0 : i32
    %c0_i32_1 = arith.constant 0 : i32
    return %c0_i32, %c0_i32_0 : i32, i32
  }
  func.func @transform_6(%arg0: i32) -> (i32, i32) {
    %c0_i32 = arith.constant 0 : i32
    %c0_i32_0 = arith.constant 0 : i32
    %c0_i32_1 = arith.constant 0 : i32
    return %c0_i32, %c0_i32_0 : i32, i32
  }
  func.func @transform_7(%arg0: i32) -> (i32, i32) {
    %c0_i32 = arith.constant 0 : i32
    %c0_i32_0 = arith.constant 0 : i32
    return %arg0, %c0_i32 : i32, i32
  }
}

</mosaic_0001>

<bundles_post_ra>
// kernel: tpu_custom_call.1
= control target key start
LH: loop header
LB: loop body
LE: loop exit
PB: predicated region body
PF: predicated region fallthrough
CT: control target
= control target key end

     0   :  { %12 = vsyncpa [#allocation3], 0  ;;  %s673_s0 = inlined_call_operand.vmem [shape: f32[8,16], index: 0, kind: input, shape index: {}]   ;;  %s674_s1 = inlined_call_operand.hbm [shape: bf16[16,128], index: 1, kind: input, shape index: {}]   ;;  %s675_s2 = inlined_call_operand.vmem [shape: f32[1,128], index: 2, kind: input, shape index: {}]   ;;  %s676_s3 = inlined_call_operand.vmem [shape: bf16[128,128], index: 3, kind: input, shape index: {}]   ;;  %s677_s4 = inlined_call_operand.vmem [shape: f32[1,128], index: 4, kind: input, shape index: {}]   ;;  %s678_s5 = inlined_call_operand.vmem [shape: bf16[128,8], index: 5, kind: input, shape index: {}]   ;;  %s679_s6 = inlined_call_operand.vmem [shape: f32[1,8], index: 6, kind: input, shape index: {}]   ;;  %s680_s7 = inlined_call_operand.hbm [shape: f32[8,8], index: 7, kind: output, shape index: {}]  }
   0x1   :  { %13 = vsyncpa [#allocation4], 0  ;;  %s515_s24 = smov [#allocation2]   ;;  %s467_s28 = scalar_lea.hbm %s674_s1, 128 }
   0x2   :  { %s21_s25 = sshll.u32 %s515_s24, 4  ;;  %p468_p0 = scmp.ne.s32.totalorder %s674_s1, %s467_s28  ;;  %s22_s25 = int_to_ptr.vmem [resolvable:$true] %s21_s25 }
   0x3   :  { %p471_p1 = scmp.lt.u32.totalorder %s467_s28, %s674_s1 }
   0x5   :  { %p473_p2 = pnand %p471_p1, %p468_p0 }
   0x7   :  { %476 = shalt.err (!%p473_p2)
}
   0x8   :  { %s477_s10 = scalar_lea.vmem %s22_s25, 128  ;;  %p482_p4 = scmp.lt.s32.totalorder %s22_s25, %s22_s25 }
   0x9   :  { %p478_p3 = scmp.ne.s32.totalorder %s22_s25, %s477_s10  ;;  %p483_p5 = scmp.lt.s32.totalorder %s477_s10, %s477_s10 }
   0xb   :  { %p484_p6 = por %p483_p5, %p482_p4 }
   0xd   :  { %p485_p7 = pnand %p484_p6, %p478_p3 }
   0xf   :  { %488 = shalt.err (!%p485_p7)
}
  0x10   :  { %s516_s11 = smov 64   ;;  %s517_s12 = smov 4  }
  0x11   :  { %27 = dma.hbm_to_vmem [thread:$0]  %s674_s1, 128, %s22_s25, [#allocation3], %s516_s11, %s516_s11, %s517_s12  }
  0x12   :  { %511 = dma.done.wait [#allocation3], 128  }
  0x13   :  { %512 = vsyncadd [#allocation3], 4294967168  ;;  %v518_v0 = vmov 0.0   ;;  %vm519_vm0 = vmmov 0   ;;  %v450_v1 = vld [vmem:[#allocation2] sm:$0xff]   ;;  %v43_v3 = vld [vmem:[%s673_s0 + $0x8] sm:$0xff] }
  0x14   :  { %396 = vmatprep.subr.bf16.mxu0 %v518_v0  ;;  %398 = vmatprep.mubr.msk.bf16.mxu0 %vm519_vm0, %v518_v0  ;;  %v42_v2 = vld [vmem:[%s673_s0] sm:$0xff]  ;;  %vm60_vm1 = vcmask 130048   ;;  %v452_v6 = vld [vmem:[%s676_s3 + $0x8] sm:$0xff]   ;;  %v453_v7 = vld [vmem:[%s676_s3 + $0x10] sm:$0xff]   ;;  %vm335_vm2 = vcmask 64512  }
  0x15   :  { %402 = vmatprep.subr.bf16.mxu1 %v518_v0  ;;  %418 = vmatprep.mubr.msk.bf16.mxu1 %vm519_vm0, %v518_v0  ;;  %v44_v4 = vpack.c.bf16 %v43_v3, %v42_v2  ;;  %v451_v5 = vld [vmem:[%s676_s3] sm:$0xff]   ;;  %v454_v8 = vld [vmem:[%s676_s3 + $0x18] sm:$0xff]   ;;  %v456_v10 = vld [vmem:[%s676_s3 + $0x28] sm:$0xff]  }
  0x16   :  { %397 = vmatpush3.bf16.msra.mxu0 %v450_v1  ;;  %403 = vmatpush3.bf16.msra.mxu1 %v451_v5  ;;  %v455_v9 = vld [vmem:[%s676_s3 + $0x20] sm:$0xff]   ;;  %v457_v11 = vld [vmem:[%s676_s3 + $0x30] sm:$0xff]   ;;  %v458_v12 = vld [vmem:[%s676_s3 + $0x38] sm:$0xff]  }
  0x17   :  { %422 = vmatprep.subr.bf16.mxu0 %v518_v0  ;;  %404 = vmatprep.subr.bf16.mxu1 %v518_v0  ;;  %v459_v13 = vld [vmem:[%s678_s5] sm:$0xff]   ;;  %v460_v14 = vld [vmem:[%s678_s5 + $0x8] sm:$0xff]   ;;  %v461_v15 = vld [vmem:[%s678_s5 + $0x10] sm:$0xff]  }
  0x18   :  { %v462_v16 = vld [vmem:[%s678_s5 + $0x18] sm:$0xff]   ;;  %v463_v17 = vld [vmem:[%s678_s5 + $0x20] sm:$0xff]   ;;  %v464_v18 = vld [vmem:[%s678_s5 + $0x28] sm:$0xff]  }
  0x19   :  { %399 = vmatmul.mubr.msk.bf16.vlgmr.msra.gmra.mrb[0].mxu0 %vm60_vm1, %v44_v4  ;;  %v355_v19 = vld [vmem:[%s675_s2] ss:$0 sm:$0xff]  ;;  %v465_v29 = vld [vmem:[%s678_s5 + $0x30] sm:$0xff]   ;;  %v466_v30 = vld [vmem:[%s678_s5 + $0x38] sm:$0xff]  }
  0x1a   :  { %438 = vmatprep.mubr.msk.bf16.mxu0 %vm519_vm0, %v518_v0  ;;  %405 = vmatpush3.bf16.msra.mxu1 %v452_v6  ;;  %v358_v31 = vld [vmem:[%s677_s4] ss:$0 sm:$0xff] }
  0x1b   :  { %406 = vmatprep.subr.bf16.mxu1 %v518_v0  ;;  %423 = vmatpush3.bf16.msra.mxu0 %v459_v13  ;;  %v367_v41 = vld [vmem:[%s679_s6] ss:$0 sm:$0xff] }
  0x1c   :  { %424 = vmatprep.subr.bf16.mxu0 %v518_v0 }
  0x1e   :  { %407 = vmatpush3.bf16.msra.mxu1 %v453_v7 }
  0x1f   :  { %408 = vmatprep.subr.bf16.mxu1 %v518_v0  ;;  %425 = vmatpush3.bf16.msra.mxu0 %v460_v14 }
  0x20   :  { %426 = vmatprep.subr.bf16.mxu0 %v518_v0 }
  0x22   :  { %409 = vmatpush3.bf16.msra.mxu1 %v454_v8 }
  0x23   :  { %410 = vmatprep.subr.bf16.mxu1 %v518_v0  ;;  %427 = vmatpush3.bf16.msra.mxu0 %v461_v15 }
  0x24   :  { %428 = vmatprep.subr.bf16.mxu0 %v518_v0 }
  0x26   :  { %411 = vmatpush3.bf16.msra.mxu1 %v455_v9 }
  0x27   :  { %412 = vmatprep.subr.bf16.mxu1 %v518_v0  ;;  %429 = vmatpush3.bf16.msra.mxu0 %v462_v16 }
  0x28   :  { %430 = vmatprep.subr.bf16.mxu0 %v518_v0 }
  0x2a   :  { %413 = vmatpush3.bf16.msra.mxu1 %v456_v10 }
  0x2b   :  { %414 = vmatprep.subr.bf16.mxu1 %v518_v0  ;;  %431 = vmatpush3.bf16.msra.mxu0 %v463_v17 }
  0x2c   :  { %432 = vmatprep.subr.bf16.mxu0 %v518_v0 }
  0x2e   :  { %415 = vmatpush3.bf16.msra.mxu1 %v457_v11 }
  0x2f   :  { %416 = vmatprep.subr.bf16.mxu1 %v518_v0  ;;  %433 = vmatpush3.bf16.msra.mxu0 %v464_v18 }
  0x30   :  { %434 = vmatprep.subr.bf16.mxu0 %v518_v0 }
  0x32   :  { %417 = vmatpush3.bf16.msra.mxu1 %v458_v12 }
  0x33   :  { %435 = vmatpush3.bf16.msra.mxu0 %v465_v29 }
  0x34   :  { %436 = vmatprep.subr.bf16.mxu0 %v518_v0 }
  0x37   :  { %437 = vmatpush3.bf16.msra.mxu0 %v466_v30 }
  0xec   :  { %v98_v20 = vpop.f32.mrb[0].mxu0 }
  0xed   :  { %v99_v21 = vadd.f32 %v355_v19, %v98_v20  ;;  %v400_v22 = vpop.f32.mrb[1].mxu0 }
  0xee   :  { %v101_v23 = vpop.f32.mrb[2].mxu0 }
  0xef   :  { %v102_v24 = vadd.f32 %v355_v19, %v101_v23  ;;  %v401_v25 = vpop.f32.mrb[3].mxu0  ;;  %v105_v26 = vmax.f32 %v99_v21, 0.0 }
  0xf1   :  { %v106_v27 = vmax.f32 %v102_v24, 0.0 }
  0xf3   :  { %v107_v28 = vpack.c.bf16 %v106_v27, %v105_v26 }
  0xf5   :  { %419 = vmatmul.mubr.bf16.vlgmr.msra.gmra.mrb[0].mxu1 %v107_v28 }
 0x1c8   :  { %v213_v32 = vpop.f32.mrb[0].mxu1 }
 0x1c9   :  { %v214_v33 = vadd.f32 %v358_v31, %v213_v32  ;;  %v420_v34 = vpop.f32.mrb[1].mxu1 }
 0x1ca   :  { %v216_v35 = vpop.f32.mrb[2].mxu1 }
 0x1cb   :  { %v217_v36 = vadd.f32 %v358_v31, %v216_v35  ;;  %v421_v37 = vpop.f32.mrb[3].mxu1  ;;  %v220_v38 = vmax.f32 %v214_v33, 0.0 }
 0x1cd   :  { %v221_v39 = vmax.f32 %v217_v36, 0.0 }
 0x1cf   :  { %v222_v40 = vpack.c.bf16 %v221_v39, %v220_v38 }
 0x1d1   :  { %439 = vmatmul.mubr.bf16.vlgmr.msra.gmra.mrb[4].mxu0 %v222_v40 }
 0x2a4   :  { %v328_v42 = vpop.f32.mrb[4].mxu0 }
 0x2a5   :  { %v329_v43 = vadd.f32 %v367_v41, %v328_v42  ;;  %v440_v44 = vpop.f32.mrb[5].mxu0 }
 0x2a6   :  { %v331_v45 = vpop.f32.mrb[6].mxu0 }
 0x2a7   :  { %336 = vst.msk [vmem:[#allocation5] sm:$0xff] %vm335_vm2, %v329_v43  ;;  %v332_v46 = vadd.f32 %v367_v41, %v331_v45  ;;  %v441_v47 = vpop.f32.mrb[7].mxu0 }
 0x2a9   :  { %337 = vst.msk [vmem:[#allocation5 + $0x8] sm:$0xff] %vm335_vm2, %v332_v46 }
 0x2aa   :  { %342 = vsyncadd [#allocation4], 128  ;;  %s520_s4 = smov [#allocation5]  }
 0x2ab   :  { %s343_s5 = sshll.u32 %s520_s4, 4  ;;  %s344_s5 = int_to_ptr.vmem [resolvable:$true] %s343_s5 }
 0x2ac   :  { %s489_s28 = scalar_lea.vmem %s344_s5, 128  ;;  %s493_s29 = scalar_lea.vmem %s344_s5, 256 }
 0x2ad   :  { %p490_p8 = scmp.ne.s32.totalorder %s344_s5, %s489_s28  ;;  %p494_p9 = scmp.lt.s32.totalorder %s344_s5, %s344_s5 }
 0x2ae   :  { %p495_p10 = scmp.lt.s32.totalorder %s493_s29, %s489_s28 }
 0x2b0   :  { %p496_p11 = por %p495_p10, %p494_p9 }
 0x2b2   :  { %p497_p12 = pnand %p496_p11, %p490_p8 }
 0x2b4   :  { %500 = shalt.err (!%p497_p12)
}
 0x2b5   :  { %s501_s8 = scalar_lea.hbm %s680_s7, 128 }
 0x2b6   :  { %p502_p13 = scmp.ne.s32.totalorder %s680_s7, %s501_s8  ;;  %p505_p0 = scmp.lt.u32.totalorder %s501_s8, %s680_s7 }
 0x2b8   :  { %p507_p1 = pnand %p505_p0, %p502_p13 }
 0x2ba   :  { %510 = shalt.err (!%p507_p1)
}
 0x2bb   :  { %s521_s13 = smov 128   ;;  %s522_s14 = smov 8  }
 0x2bc   :  { %349 = dma.vmem_to_hbm [thread:$0]  %s344_s5, 128, %s680_s7, [#allocation4], %s521_s13, %s521_s13, %s522_s14  }
 0x2bd   :  { %513 = dma.done.wait [#allocation4], 256  }
 0x2be   :  { %514 = vsyncadd [#allocation4], 4294967040 }
 0x2bf   :  { %353 = vsyncpa [#allocation3], 1 }
 0x2c0   :  { %354 = vsyncpa [#allocation4], 1 }

</bundles_post_ra>
